<compile_context>
chip_gen: v6e
topology: v6e:2x2x1
jax: 0.10.0
libtpu: 0.0.40
codegen_flags: <defaults>
</compile_context>

<pallas_src>
import jax
import jax.numpy as jnp
from jax.experimental import pallas as pl
from jax.experimental.pallas import tpu as pltpu

LANES = 128
ROW_TILE = 1024  # 1024x128 f32 = 512 KiB / channel / buffer -> ~6 MiB double-buffered


# --------------------------------------------------------------------------------------
# Pallas kernel: per-pixel quadratic BGR transform (Horner form, lane-dense layout).
# --------------------------------------------------------------------------------------
def _wb_quadratic_kernel(coef_ref, x_ref, o_ref):
    # coef_ref: (N*30,) f32 flat in SMEM (whole array; 1-D to avoid 2-D SMEM padding)
    # x_ref   : (1, 3, row_tile, 128) VMEM block   (channels are B, G, R)
    # o_ref   : (1, 3, row_tile, 128) VMEM block
    base = pl.program_id(0) * 30

    b = x_ref[0, 0, :, :].astype(jnp.float32)
    g = x_ref[0, 1, :, :].astype(jnp.float32)
    r = x_ref[0, 2, :, :].astype(jnp.float32)

    for c in range(3):
        c0 = coef_ref[base + 10 * c + 0]
        c1 = coef_ref[base + 10 * c + 1]
        c2 = coef_ref[base + 10 * c + 2]
        c3 = coef_ref[base + 10 * c + 3]
        c4 = coef_ref[base + 10 * c + 4]
        c5 = coef_ref[base + 10 * c + 5]
        c6 = coef_ref[base + 10 * c + 6]
        c7 = coef_ref[base + 10 * c + 7]
        c8 = coef_ref[base + 10 * c + 8]
        c9 = coef_ref[base + 10 * c + 9]
        # out_c = c0 b^2 + c1 g^2 + c2 r^2 + c3 bg + c4 br + c5 gr + c6 b + c7 g + c8 r + c9
        acc = (b * (c0 * b + c3 * g + c4 * r + c6)
               + g * (c1 * g + c5 * r + c7)
               + r * (c2 * r + c8)
               + c9)
        o_ref[0, c, :, :] = jnp.clip(acc, 0.0, 1.0).astype(o_ref.dtype)


def _pick_row_tile(n, rows, align):
    """Fixed-size tile + cdiv grid.  Block row dim is a multiple of `align` or the
    full extent, so the (8/16, 128) layout constraint is always satisfied."""
    if rows <= ROW_TILE:
        if n == 1 and rows >= 4 * align:
            # Single-image batch: split into >=2 aligned tiles so both v7x cores work.
            half = ((rows + 1) // 2 + align - 1) // align * align
            return min(half, rows)
        return rows            # full-extent row block: always layout-legal
    return ROW_TILE            # multiple of 16 -> legal for f32 and bf16


def wb_quadratic_transform(img, coef):
    """Apply the quadratic WB transform.  img: (N, 3, H, W), coef: (N, 30)."""
    n, c, h, w = img.shape
    assert c == 3, "expected a 3-channel (BGR) image"
    s = h * w
    itemsize = jnp.dtype(img.dtype).itemsize
    align = 8 if itemsize == 4 else 16

    if s % LANES == 0:
        # Fast path: pure reshape, zero extra HBM traffic.
        rows = s // LANES
        x = img.reshape(n, 3, rows, LANES)
        padded = False
    else:
        # TODO(synk): handle the <128-element ragged tail with a masked in-kernel store
        #             instead of a full pad + slice HBM round-trip.
        rows = pl.cdiv(s, LANES)
        x = jnp.pad(img.reshape(n, 3, s), ((0, 0), (0, 0), (0, rows * LANES - s)))
        x = x.reshape(n, 3, rows, LANES)
        padded = True

    row_tile = _pick_row_tile(n, rows, align)
    grid = (n, pl.cdiv(rows, row_tile))

    coef_flat = coef.reshape(-1).astype(jnp.float32)          # 1-D SMEM, no 2-D padding
    flops = int(n) * int(rows) * LANES * 45                   # Horner: ~15 ops/px/channel
    bytes_accessed = 2 * n * 3 * rows * LANES * itemsize + int(coef_flat.size) * 4

    out = pl.pallas_call(
        _wb_quadratic_kernel,
        out_shape=jax.ShapeDtypeStruct((n, 3, rows, LANES), img.dtype),
        grid_spec=pltpu.PrefetchScalarGridSpec(
            num_scalar_prefetch=0,
            grid=grid,
            in_specs=[
                pl.BlockSpec(memory_space=pltpu.MemorySpace.SMEM),       # flat coefficients
                pl.BlockSpec((1, 3, row_tile, LANES), lambda i, j: (i, 0, j, 0)),
            ],
            out_specs=pl.BlockSpec((1, 3, row_tile, LANES), lambda i, j: (i, 0, j, 0)),
        ),
        compiler_params=pltpu.CompilerParams(
            dimension_semantics=("parallel", "parallel"),
        ),
        cost_estimate=pl.CostEstimate(
            flops=flops, transcendentals=0, bytes_accessed=bytes_accessed),
    )(coef_flat, x)

    out = out.reshape(n, 3, rows * LANES)
    if padded:
        out = out[:, :, :s]
    return out.reshape(n, 3, h, w)


# --------------------------------------------------------------------------------------
# Conditioning head (plain JAX, faithful to the PyTorch _fc_forward).
# --------------------------------------------------------------------------------------
def _histc01(x, bins):
    """torch.histc(x, bins, min=0, max=1): out-of-range ignored, x==1 -> last bin.
    Vectorized bin-compare reduction (no serialized scatter-add on TPU)."""
    x = x.reshape(-1).astype(jnp.float32)
    in_range = (x >= 0.0) & (x <= 1.0)
    idx = jnp.clip(jnp.floor(x * bins).astype(jnp.int32), 0, bins - 1)
    onehot = (idx[:, None] == jnp.arange(bins, dtype=jnp.int32)[None, :]) & in_range[:, None]
    return jnp.sum(onehot.astype(jnp.float32), axis=0)


class ConditionalWbQuadratic:
    """JAX/Pallas port of the PyTorch ConditionalWbQuadratic module."""

    MODULE_PARAMS = 30

    def __init__(self, in_channels):
        assert in_channels[0] % 3 == 0
        self.hist_bin = in_channels[0] // 3
        self.in_out_channels = list(in_channels) + [self.MODULE_PARAMS]
        self.total_params = 0
        for idx in range(len(in_channels)):
            in_ch = self.in_out_channels[idx]
            out_ch = self.in_out_channels[idx + 1]
            self.total_params += in_ch * out_ch + out_ch
        self.total_params += self.MODULE_PARAMS
        self.module_params = self.MODULE_PARAMS

    def _fc_forward(self, img, params):
        assert params.shape[0] == self.total_params
        assert img.shape[1] == 3
        n = img.shape[0]

        flat = img.reshape(n, 3, -1).astype(jnp.float32)
        hist = jax.vmap(jax.vmap(lambda x: _histc01(x, self.hist_bin)))(flat)  # (N, 3, bins)
        img_hist = jax.lax.stop_gradient(hist.reshape(n, 3 * self.hist_bin))

        par_idx = 0
        layers = len(self.in_out_channels) - 1
        feat = img_hist
        for idx in range(layers):
            in_ch = self.in_out_channels[idx]
            out_ch = self.in_out_channels[idx + 1]
            w = params[par_idx:par_idx + in_ch * out_ch].reshape(in_ch, out_ch)
            par_idx += in_ch * out_ch
            bvec = params[par_idx:par_idx + out_ch]
            par_idx += out_ch
            feat = feat @ w + bvec
            if idx != layers - 1:
                feat = jax.nn.relu(feat)
        assert par_idx == self.total_params - self.module_params

        global_param = params[par_idx]                 # single scalar, as in the PyTorch code
        return jax.nn.sigmoid(global_param + feat)     # (N, 30)

    def forward(self, img, params):
        coef = self._fc_forward(img, params) * 10.0 - 5.0       # (N, 30)
        return wb_quadratic_transform(img, coef)


# --------------------------------------------------------------------------------------
# Pure-JAX reference of the per-pixel transform (runtime correctness check).
# --------------------------------------------------------------------------------------
def _reference_transform(img, coef):
    b, g, r = img[:, 0], img[:, 1], img[:, 2]
    ones = jnp.ones_like(b)
    feats = jnp.stack([b * b, g * g, r * r, b * g, b * r, g * r, b, g, r, ones], axis=-1)
    par = coef.reshape(coef.shape[0], 3, 10)
    out = jnp.einsum("nhwk,nck->nchw", feats, par)
    return jnp.clip(out, 0.0, 1.0)


if __name__ == "__main__":
    key = jax.random.PRNGKey(0)
    k_img, k_img2, k_par = jax.random.split(key, 3)

    in_channels = (24, 16)                # hist_bin = 8; conditioning MLP 24 -> 16 -> 30
    module = ConditionalWbQuadratic(in_channels)
    params = 0.05 * jax.random.normal(k_par, (module.total_params,), dtype=jnp.float32)

    # Case 1: lane-aligned spatial size (zero-copy fast path).
    img = jax.random.uniform(k_img, (2, 3, 16, 16), dtype=jnp.float32)
    out = jax.block_until_ready(module.forward(img, params))
    assert out.shape == img.shape and out.dtype == img.dtype
    coef = module._fc_forward(img, params) * 10.0 - 5.0
    err = float(jnp.max(jnp.abs(out - _reference_transform(img, coef))))
    assert err < 1e-5, f"aligned path: max abs error vs JAX reference: {err}"

    # Case 2: ragged spatial size (pad path + partial handling).
    img2 = jax.random.uniform(k_img2, (1, 3, 10, 13), dtype=jnp.float32)
    out2 = jax.block_until_ready(module.forward(img2, params))
    assert out2.shape == img2.shape and out2.dtype == img2.dtype
    coef2 = module._fc_forward(img2, params) * 10.0 - 5.0
    err2 = float(jnp.max(jnp.abs(out2 - _reference_transform(img2, coef2))))
    assert err2 < 1e-5, f"ragged path: max abs error vs JAX reference: {err2}"

    print("KERNEL_OK")
</pallas_src>

<mosaic_0001>
module attributes {stable_mosaic.version = 11 : i64} {
  func.func @_wb_quadratic_kernel(%arg0: i32, %arg1: i32, %arg2: memref<60xf32, #tpu.memory_space<smem>>, %arg3: memref<1x3x2x128xf32, #tpu.memory_space<vmem>>, %arg4: memref<1x3x2x128xf32, #tpu.memory_space<vmem>>) attributes {dimension_semantics = [#tpu.dimension_semantics<parallel>, #tpu.dimension_semantics<parallel>], iteration_bounds = array<i64: 2, 1>, scalar_prefetch = 0 : i64, scratch_operands = 0 : i64, tpu.core_type = #tpu.core_type<tc>, window_params = [{transform_indices = @transform_0, window_bounds = array<i64: 60>}, {transform_indices = @transform_1, window_bounds = array<i64: 1, 3, 2, 128>}, {transform_indices = @transform_2, window_bounds = array<i64: 1, 3, 2, 128>}]} {
    %c30_i32 = arith.constant 30 : i32
    %0 = arith.muli %arg0, %c30_i32 : i32
    %c0 = arith.constant 0 : index
    %c0_0 = arith.constant 0 : index
    %c0_1 = arith.constant 0 : index
    %c0_2 = arith.constant 0 : index
    %1 = vector.load %arg3[%c0, %c0_0, %c0_1, %c0_2] : memref<1x3x2x128xf32, #tpu.memory_space<vmem>>, vector<1x1x2x128xf32>
    %2 = vector.shape_cast %1 : vector<1x1x2x128xf32> to vector<2x128xf32>
    %c0_3 = arith.constant 0 : index
    %c1 = arith.constant 1 : index
    %c0_4 = arith.constant 0 : index
    %c0_5 = arith.constant 0 : index
    %3 = vector.load %arg3[%c0_3, %c1, %c0_4, %c0_5] : memref<1x3x2x128xf32, #tpu.memory_space<vmem>>, vector<1x1x2x128xf32>
    %4 = vector.shape_cast %3 : vector<1x1x2x128xf32> to vector<2x128xf32>
    %c0_6 = arith.constant 0 : index
    %c2 = arith.constant 2 : index
    %c0_7 = arith.constant 0 : index
    %c0_8 = arith.constant 0 : index
    %5 = vector.load %arg3[%c0_6, %c2, %c0_7, %c0_8] : memref<1x3x2x128xf32, #tpu.memory_space<vmem>>, vector<1x1x2x128xf32>
    %6 = vector.shape_cast %5 : vector<1x1x2x128xf32> to vector<2x128xf32>
    %c0_i32 = arith.constant 0 : i32
    %7 = arith.addi %0, %c0_i32 : i32
    %c0_i32_9 = arith.constant 0 : i32
    %8 = arith.addi %7, %c0_i32_9 : i32
    %9 = arith.index_cast %8 : i32 to index
    %10 = memref.load %arg2[%9] : memref<60xf32, #tpu.memory_space<smem>>
    %c0_i32_10 = arith.constant 0 : i32
    %11 = arith.addi %0, %c0_i32_10 : i32
    %c1_i32 = arith.constant 1 : i32
    %12 = arith.addi %11, %c1_i32 : i32
    %13 = arith.index_cast %12 : i32 to index
    %14 = memref.load %arg2[%13] : memref<60xf32, #tpu.memory_space<smem>>
    %c0_i32_11 = arith.constant 0 : i32
    %15 = arith.addi %0, %c0_i32_11 : i32
    %c2_i32 = arith.constant 2 : i32
    %16 = arith.addi %15, %c2_i32 : i32
    %17 = arith.index_cast %16 : i32 to index
    %18 = memref.load %arg2[%17] : memref<60xf32, #tpu.memory_space<smem>>
    %c0_i32_12 = arith.constant 0 : i32
    %19 = arith.addi %0, %c0_i32_12 : i32
    %c3_i32 = arith.constant 3 : i32
    %20 = arith.addi %19, %c3_i32 : i32
    %21 = arith.index_cast %20 : i32 to index
    %22 = memref.load %arg2[%21] : memref<60xf32, #tpu.memory_space<smem>>
    %c0_i32_13 = arith.constant 0 : i32
    %23 = arith.addi %0, %c0_i32_13 : i32
    %c4_i32 = arith.constant 4 : i32
    %24 = arith.addi %23, %c4_i32 : i32
    %25 = arith.index_cast %24 : i32 to index
    %26 = memref.load %arg2[%25] : memref<60xf32, #tpu.memory_space<smem>>
    %c0_i32_14 = arith.constant 0 : i32
    %27 = arith.addi %0, %c0_i32_14 : i32
    %c5_i32 = arith.constant 5 : i32
    %28 = arith.addi %27, %c5_i32 : i32
    %29 = arith.index_cast %28 : i32 to index
    %30 = memref.load %arg2[%29] : memref<60xf32, #tpu.memory_space<smem>>
    %c0_i32_15 = arith.constant 0 : i32
    %31 = arith.addi %0, %c0_i32_15 : i32
    %c6_i32 = arith.constant 6 : i32
    %32 = arith.addi %31, %c6_i32 : i32
    %33 = arith.index_cast %32 : i32 to index
    %34 = memref.load %arg2[%33] : memref<60xf32, #tpu.memory_space<smem>>
    %c0_i32_16 = arith.constant 0 : i32
    %35 = arith.addi %0, %c0_i32_16 : i32
    %c7_i32 = arith.constant 7 : i32
    %36 = arith.addi %35, %c7_i32 : i32
    %37 = arith.index_cast %36 : i32 to index
    %38 = memref.load %arg2[%37] : memref<60xf32, #tpu.memory_space<smem>>
    %c0_i32_17 = arith.constant 0 : i32
    %39 = arith.addi %0, %c0_i32_17 : i32
    %c8_i32 = arith.constant 8 : i32
    %40 = arith.addi %39, %c8_i32 : i32
    %41 = arith.index_cast %40 : i32 to index
    %42 = memref.load %arg2[%41] : memref<60xf32, #tpu.memory_space<smem>>
    %c0_i32_18 = arith.constant 0 : i32
    %43 = arith.addi %0, %c0_i32_18 : i32
    %c9_i32 = arith.constant 9 : i32
    %44 = arith.addi %43, %c9_i32 : i32
    %45 = arith.index_cast %44 : i32 to index
    %46 = memref.load %arg2[%45] : memref<60xf32, #tpu.memory_space<smem>>
    %47 = vector.broadcast %10 : f32 to vector<2x128xf32>
    %48 = arith.mulf %47, %2 : vector<2x128xf32>
    %49 = vector.broadcast %22 : f32 to vector<2x128xf32>
    %50 = arith.mulf %49, %4 : vector<2x128xf32>
    %51 = arith.addf %48, %50 : vector<2x128xf32>
    %52 = vector.broadcast %26 : f32 to vector<2x128xf32>
    %53 = arith.mulf %52, %6 : vector<2x128xf32>
    %54 = arith.addf %51, %53 : vector<2x128xf32>
    %55 = vector.broadcast %34 : f32 to vector<2x128xf32>
    %56 = arith.addf %54, %55 : vector<2x128xf32>
    %57 = arith.mulf %2, %56 : vector<2x128xf32>
    %58 = vector.broadcast %14 : f32 to vector<2x128xf32>
    %59 = arith.mulf %58, %4 : vector<2x128xf32>
    %60 = vector.broadcast %30 : f32 to vector<2x128xf32>
    %61 = arith.mulf %60, %6 : vector<2x128xf32>
    %62 = arith.addf %59, %61 : vector<2x128xf32>
    %63 = vector.broadcast %38 : f32 to vector<2x128xf32>
    %64 = arith.addf %62, %63 : vector<2x128xf32>
    %65 = arith.mulf %4, %64 : vector<2x128xf32>
    %66 = arith.addf %57, %65 : vector<2x128xf32>
    %67 = vector.broadcast %18 : f32 to vector<2x128xf32>
    %68 = arith.mulf %67, %6 : vector<2x128xf32>
    %69 = vector.broadcast %42 : f32 to vector<2x128xf32>
    %70 = arith.addf %68, %69 : vector<2x128xf32>
    %71 = arith.mulf %6, %70 : vector<2x128xf32>
    %72 = arith.addf %66, %71 : vector<2x128xf32>
    %73 = vector.broadcast %46 : f32 to vector<2x128xf32>
    %74 = arith.addf %72, %73 : vector<2x128xf32>
    %cst = arith.constant 0.000000e+00 : f32
    %cst_19 = arith.constant 1.000000e+00 : f32
    %75 = vector.broadcast %cst : f32 to vector<2x128xf32>
    %76 = arith.maximumf %75, %74 : vector<2x128xf32>
    %77 = vector.broadcast %cst_19 : f32 to vector<2x128xf32>
    %78 = arith.minimumf %77, %76 : vector<2x128xf32>
    %c0_20 = arith.constant 0 : index
    %c0_21 = arith.constant 0 : index
    %c0_22 = arith.constant 0 : index
    %c0_23 = arith.constant 0 : index
    %79 = vector.load %arg4[%c0_20, %c0_21, %c0_22, %c0_23] : memref<1x3x2x128xf32, #tpu.memory_space<vmem>>, vector<1x1x2x128xf32>
    %80 = vector.shape_cast %79 : vector<1x1x2x128xf32> to vector<2x128xf32>
    %81 = vector.shape_cast %78 : vector<2x128xf32> to vector<1x1x2x128xf32>
    tpu.vector_store %arg4[%c0_20, %c0_21, %c0_22, %c0_23], %81 {strides = array<i32>} : memref<1x3x2x128xf32, #tpu.memory_space<vmem>>, vector<1x1x2x128xf32>,
    %c10_i32 = arith.constant 10 : i32
    %82 = arith.addi %0, %c10_i32 : i32
    %c0_i32_24 = arith.constant 0 : i32
    %83 = arith.addi %82, %c0_i32_24 : i32
    %84 = arith.index_cast %83 : i32 to index
    %85 = memref.load %arg2[%84] : memref<60xf32, #tpu.memory_space<smem>>
    %c10_i32_25 = arith.constant 10 : i32
    %86 = arith.addi %0, %c10_i32_25 : i32
    %c1_i32_26 = arith.constant 1 : i32
    %87 = arith.addi %86, %c1_i32_26 : i32
    %88 = arith.index_cast %87 : i32 to index
    %89 = memref.load %arg2[%88] : memref<60xf32, #tpu.memory_space<smem>>
    %c10_i32_27 = arith.constant 10 : i32
    %90 = arith.addi %0, %c10_i32_27 : i32
    %c2_i32_28 = arith.constant 2 : i32
    %91 = arith.addi %90, %c2_i32_28 : i32
    %92 = arith.index_cast %91 : i32 to index
    %93 = memref.load %arg2[%92] : memref<60xf32, #tpu.memory_space<smem>>
    %c10_i32_29 = arith.constant 10 : i32
    %94 = arith.addi %0, %c10_i32_29 : i32
    %c3_i32_30 = arith.constant 3 : i32
    %95 = arith.addi %94, %c3_i32_30 : i32
    %96 = arith.index_cast %95 : i32 to index
    %97 = memref.load %arg2[%96] : memref<60xf32, #tpu.memory_space<smem>>
    %c10_i32_31 = arith.constant 10 : i32
    %98 = arith.addi %0, %c10_i32_31 : i32
    %c4_i32_32 = arith.constant 4 : i32
    %99 = arith.addi %98, %c4_i32_32 : i32
    %100 = arith.index_cast %99 : i32 to index
    %101 = memref.load %arg2[%100] : memref<60xf32, #tpu.memory_space<smem>>
    %c10_i32_33 = arith.constant 10 : i32
    %102 = arith.addi %0, %c10_i32_33 : i32
    %c5_i32_34 = arith.constant 5 : i32
    %103 = arith.addi %102, %c5_i32_34 : i32
    %104 = arith.index_cast %103 : i32 to index
    %105 = memref.load %arg2[%104] : memref<60xf32, #tpu.memory_space<smem>>
    %c10_i32_35 = arith.constant 10 : i32
    %106 = arith.addi %0, %c10_i32_35 : i32
    %c6_i32_36 = arith.constant 6 : i32
    %107 = arith.addi %106, %c6_i32_36 : i32
    %108 = arith.index_cast %107 : i32 to index
    %109 = memref.load %arg2[%108] : memref<60xf32, #tpu.memory_space<smem>>
    %c10_i32_37 = arith.constant 10 : i32
    %110 = arith.addi %0, %c10_i32_37 : i32
    %c7_i32_38 = arith.constant 7 : i32
    %111 = arith.addi %110, %c7_i32_38 : i32
    %112 = arith.index_cast %111 : i32 to index
    %113 = memref.load %arg2[%112] : memref<60xf32, #tpu.memory_space<smem>>
    %c10_i32_39 = arith.constant 10 : i32
    %114 = arith.addi %0, %c10_i32_39 : i32
    %c8_i32_40 = arith.constant 8 : i32
    %115 = arith.addi %114, %c8_i32_40 : i32
    %116 = arith.index_cast %115 : i32 to index
    %117 = memref.load %arg2[%116] : memref<60xf32, #tpu.memory_space<smem>>
    %c10_i32_41 = arith.constant 10 : i32
    %118 = arith.addi %0, %c10_i32_41 : i32
    %c9_i32_42 = arith.constant 9 : i32
    %119 = arith.addi %118, %c9_i32_42 : i32
    %120 = arith.index_cast %119 : i32 to index
    %121 = memref.load %arg2[%120] : memref<60xf32, #tpu.memory_space<smem>>
    %122 = vector.broadcast %85 : f32 to vector<2x128xf32>
    %123 = arith.mulf %122, %2 : vector<2x128xf32>
    %124 = vector.broadcast %97 : f32 to vector<2x128xf32>
    %125 = arith.mulf %124, %4 : vector<2x128xf32>
    %126 = arith.addf %123, %125 : vector<2x128xf32>
    %127 = vector.broadcast %101 : f32 to vector<2x128xf32>
    %128 = arith.mulf %127, %6 : vector<2x128xf32>
    %129 = arith.addf %126, %128 : vector<2x128xf32>
    %130 = vector.broadcast %109 : f32 to vector<2x128xf32>
    %131 = arith.addf %129, %130 : vector<2x128xf32>
    %132 = arith.mulf %2, %131 : vector<2x128xf32>
    %133 = vector.broadcast %89 : f32 to vector<2x128xf32>
    %134 = arith.mulf %133, %4 : vector<2x128xf32>
    %135 = vector.broadcast %105 : f32 to vector<2x128xf32>
    %136 = arith.mulf %135, %6 : vector<2x128xf32>
    %137 = arith.addf %134, %136 : vector<2x128xf32>
    %138 = vector.broadcast %113 : f32 to vector<2x128xf32>
    %139 = arith.addf %137, %138 : vector<2x128xf32>
    %140 = arith.mulf %4, %139 : vector<2x128xf32>
    %141 = arith.addf %132, %140 : vector<2x128xf32>
    %142 = vector.broadcast %93 : f32 to vector<2x128xf32>
    %143 = arith.mulf %142, %6 : vector<2x128xf32>
    %144 = vector.broadcast %117 : f32 to vector<2x128xf32>
    %145 = arith.addf %143, %144 : vector<2x128xf32>
    %146 = arith.mulf %6, %145 : vector<2x128xf32>
    %147 = arith.addf %141, %146 : vector<2x128xf32>
    %148 = vector.broadcast %121 : f32 to vector<2x128xf32>
    %149 = arith.addf %147, %148 : vector<2x128xf32>
    %cst_43 = arith.constant 0.000000e+00 : f32
    %cst_44 = arith.constant 1.000000e+00 : f32
    %150 = vector.broadcast %cst_43 : f32 to vector<2x128xf32>
    %151 = arith.maximumf %150, %149 : vector<2x128xf32>
    %152 = vector.broadcast %cst_44 : f32 to vector<2x128xf32>
    %153 = arith.minimumf %152, %151 : vector<2x128xf32>
    %c0_45 = arith.constant 0 : index
    %c1_46 = arith.constant 1 : index
    %c0_47 = arith.constant 0 : index
    %c0_48 = arith.constant 0 : index
    %154 = vector.load %arg4[%c0_45, %c1_46, %c0_47, %c0_48] : memref<1x3x2x128xf32, #tpu.memory_space<vmem>>, vector<1x1x2x128xf32>
    %155 = vector.shape_cast %154 : vector<1x1x2x128xf32> to vector<2x128xf32>
    %156 = vector.shape_cast %153 : vector<2x128xf32> to vector<1x1x2x128xf32>
    tpu.vector_store %arg4[%c0_45, %c1_46, %c0_47, %c0_48], %156 {strides = array<i32>} : memref<1x3x2x128xf32, #tpu.memory_space<vmem>>, vector<1x1x2x128xf32>,
    %c20_i32 = arith.constant 20 : i32
    %157 = arith.addi %0, %c20_i32 : i32
    %c0_i32_49 = arith.constant 0 : i32
    %158 = arith.addi %157, %c0_i32_49 : i32
    %159 = arith.index_cast %158 : i32 to index
    %160 = memref.load %arg2[%159] : memref<60xf32, #tpu.memory_space<smem>>
    %c20_i32_50 = arith.constant 20 : i32
    %161 = arith.addi %0, %c20_i32_50 : i32
    %c1_i32_51 = arith.constant 1 : i32
    %162 = arith.addi %161, %c1_i32_51 : i32
    %163 = arith.index_cast %162 : i32 to index
    %164 = memref.load %arg2[%163] : memref<60xf32, #tpu.memory_space<smem>>
    %c20_i32_52 = arith.constant 20 : i32
    %165 = arith.addi %0, %c20_i32_52 : i32
    %c2_i32_53 = arith.constant 2 : i32
    %166 = arith.addi %165, %c2_i32_53 : i32
    %167 = arith.index_cast %166 : i32 to index
    %168 = memref.load %arg2[%167] : memref<60xf32, #tpu.memory_space<smem>>
    %c20_i32_54 = arith.constant 20 : i32
    %169 = arith.addi %0, %c20_i32_54 : i32
    %c3_i32_55 = arith.constant 3 : i32
    %170 = arith.addi %169, %c3_i32_55 : i32
    %171 = arith.index_cast %170 : i32 to index
    %172 = memref.load %arg2[%171] : memref<60xf32, #tpu.memory_space<smem>>
    %c20_i32_56 = arith.constant 20 : i32
    %173 = arith.addi %0, %c20_i32_56 : i32
    %c4_i32_57 = arith.constant 4 : i32
    %174 = arith.addi %173, %c4_i32_57 : i32
    %175 = arith.index_cast %174 : i32 to index
    %176 = memref.load %arg2[%175] : memref<60xf32, #tpu.memory_space<smem>>
    %c20_i32_58 = arith.constant 20 : i32
    %177 = arith.addi %0, %c20_i32_58 : i32
    %c5_i32_59 = arith.constant 5 : i32
    %178 = arith.addi %177, %c5_i32_59 : i32
    %179 = arith.index_cast %178 : i32 to index
    %180 = memref.load %arg2[%179] : memref<60xf32, #tpu.memory_space<smem>>
    %c20_i32_60 = arith.constant 20 : i32
    %181 = arith.addi %0, %c20_i32_60 : i32
    %c6_i32_61 = arith.constant 6 : i32
    %182 = arith.addi %181, %c6_i32_61 : i32
    %183 = arith.index_cast %182 : i32 to index
    %184 = memref.load %arg2[%183] : memref<60xf32, #tpu.memory_space<smem>>
    %c20_i32_62 = arith.constant 20 : i32
    %185 = arith.addi %0, %c20_i32_62 : i32
    %c7_i32_63 = arith.constant 7 : i32
    %186 = arith.addi %185, %c7_i32_63 : i32
    %187 = arith.index_cast %186 : i32 to index
    %188 = memref.load %arg2[%187] : memref<60xf32, #tpu.memory_space<smem>>
    %c20_i32_64 = arith.constant 20 : i32
    %189 = arith.addi %0, %c20_i32_64 : i32
    %c8_i32_65 = arith.constant 8 : i32
    %190 = arith.addi %189, %c8_i32_65 : i32
    %191 = arith.index_cast %190 : i32 to index
    %192 = memref.load %arg2[%191] : memref<60xf32, #tpu.memory_space<smem>>
    %c20_i32_66 = arith.constant 20 : i32
    %193 = arith.addi %0, %c20_i32_66 : i32
    %c9_i32_67 = arith.constant 9 : i32
    %194 = arith.addi %193, %c9_i32_67 : i32
    %195 = arith.index_cast %194 : i32 to index
    %196 = memref.load %arg2[%195] : memref<60xf32, #tpu.memory_space<smem>>
    %197 = vector.broadcast %160 : f32 to vector<2x128xf32>
    %198 = arith.mulf %197, %2 : vector<2x128xf32>
    %199 = vector.broadcast %172 : f32 to vector<2x128xf32>
    %200 = arith.mulf %199, %4 : vector<2x128xf32>
    %201 = arith.addf %198, %200 : vector<2x128xf32>
    %202 = vector.broadcast %176 : f32 to vector<2x128xf32>
    %203 = arith.mulf %202, %6 : vector<2x128xf32>
    %204 = arith.addf %201, %203 : vector<2x128xf32>
    %205 = vector.broadcast %184 : f32 to vector<2x128xf32>
    %206 = arith.addf %204, %205 : vector<2x128xf32>
    %207 = arith.mulf %2, %206 : vector<2x128xf32>
    %208 = vector.broadcast %164 : f32 to vector<2x128xf32>
    %209 = arith.mulf %208, %4 : vector<2x128xf32>
    %210 = vector.broadcast %180 : f32 to vector<2x128xf32>
    %211 = arith.mulf %210, %6 : vector<2x128xf32>
    %212 = arith.addf %209, %211 : vector<2x128xf32>
    %213 = vector.broadcast %188 : f32 to vector<2x128xf32>
    %214 = arith.addf %212, %213 : vector<2x128xf32>
    %215 = arith.mulf %4, %214 : vector<2x128xf32>
    %216 = arith.addf %207, %215 : vector<2x128xf32>
    %217 = vector.broadcast %168 : f32 to vector<2x128xf32>
    %218 = arith.mulf %217, %6 : vector<2x128xf32>
    %219 = vector.broadcast %192 : f32 to vector<2x128xf32>
    %220 = arith.addf %218, %219 : vector<2x128xf32>
    %221 = arith.mulf %6, %220 : vector<2x128xf32>
    %222 = arith.addf %216, %221 : vector<2x128xf32>
    %223 = vector.broadcast %196 : f32 to vector<2x128xf32>
    %224 = arith.addf %222, %223 : vector<2x128xf32>
    %cst_68 = arith.constant 0.000000e+00 : f32
    %cst_69 = arith.constant 1.000000e+00 : f32
    %225 = vector.broadcast %cst_68 : f32 to vector<2x128xf32>
    %226 = arith.maximumf %225, %224 : vector<2x128xf32>
    %227 = vector.broadcast %cst_69 : f32 to vector<2x128xf32>
    %228 = arith.minimumf %227, %226 : vector<2x128xf32>
    %c0_70 = arith.constant 0 : index
    %c2_71 = arith.constant 2 : index
    %c0_72 = arith.constant 0 : index
    %c0_73 = arith.constant 0 : index
    %229 = vector.load %arg4[%c0_70, %c2_71, %c0_72, %c0_73] : memref<1x3x2x128xf32, #tpu.memory_space<vmem>>, vector<1x1x2x128xf32>
    %230 = vector.shape_cast %229 : vector<1x1x2x128xf32> to vector<2x128xf32>
    %231 = vector.shape_cast %228 : vector<2x128xf32> to vector<1x1x2x128xf32>
    tpu.vector_store %arg4[%c0_70, %c2_71, %c0_72, %c0_73], %231 {strides = array<i32>} : memref<1x3x2x128xf32, #tpu.memory_space<vmem>>, vector<1x1x2x128xf32>,
    return
  }
  func.func @transform_0(%arg0: i32, %arg1: i32) -> i32 {
    %c0_i32 = arith.constant 0 : i32
    %c0_i32_0 = arith.constant 0 : i32
    return %c0_i32 : i32
  }
  func.func @transform_1(%arg0: i32, %arg1: i32) -> (i32, i32, i32, i32) {
    %c0_i32 = arith.constant 0 : i32
    %c0_i32_0 = arith.constant 0 : i32
    %c0_i32_1 = arith.constant 0 : i32
    return %arg0, %c0_i32, %arg1, %c0_i32_0 : i32, i32, i32, i32
  }
  func.func @transform_2(%arg0: i32, %arg1: i32) -> (i32, i32, i32, i32) {
    %c0_i32 = arith.constant 0 : i32
    %c0_i32_0 = arith.constant 0 : i32
    %c0_i32_1 = arith.constant 0 : i32
    return %arg0, %c0_i32, %arg1, %c0_i32_0 : i32, i32, i32, i32
  }
}

</mosaic_0001>

<bundles_post_ra>
// kernel: tpu_custom_call.1
= control target key start
LH: loop header
LB: loop body
LE: loop exit
PB: predicated region body
PF: predicated region fallthrough
CT: control target
= control target key end

     0   :  { %7 = vsyncpa [#allocation5], 0  ;;  %s999_s0 = inlined_call_operand.hbm [shape: f32[60], index: 0, kind: input, shape index: {}]   ;;  %s1000_s1 = inlined_call_operand.hbm [shape: f32[2,3,2,128], index: 1, kind: input, shape index: {}]   ;;  %s1001_s2 = inlined_call_operand.hbm [shape: f32[2,3,2,128], index: 2, kind: output, shape index: {}]  }
   0x1   :  { %8 = vsyncpa [#allocation3], 0 }
   0x2   :  { %10 = vsyncpa [#allocation3 + $0x1], 0 }
   0x3   :  { %11 = vsyncpa [#allocation4], 0 }
   0x4   :  { %13 = vsyncpa [#allocation4 + $0x1], 0  ;;  %s706_s9 = smov 0   ;;  %s708_s10 = smov 0  }
   0x5   :  { %s710_s11 = smov 0   ;;  %s712_s12 = smov 0  }
   0x6   :  { %s714_s13 = smov 0   ;;  %s716_s14 = smov 0  }
   0x7 LB: > { %s463_s15 = sadd.s32 4294967295, %s682_s14   ;;  %s464_s16 = sadd.s32 4294967294, %s682_s14   ;;  %s682_s14 = sphi %s716_s14, %s19_s14   ;;  %s678_s13 = sphi %s714_s13, %s1014_s13   ;;  %s674_s12 = sphi %s712_s12, %s1013_s12   ;;  %s670_s11 = sphi %s710_s11, %s1012_s11   ;;  %s666_s10 = sphi %s708_s10, %s1011_s10   ;;  %s662_s9 = sphi %s706_s9, %s1010_s9  }
   0x8   : > { %s61_s17 = sadd.s32 1, %s670_s11  ;;  %p68_p0 = scmp.ne.s32.totalorder %s670_s11, %s666_s10 }
   0x9   : > { %p69_p1 = scmp.eq.s32.totalorder %s682_s14, 0  ;;  %p74_p2 = scmp.ne.s32.totalorder %s666_s10, %s662_s9 }
   0xa   : > { %p744_p3 = scmp.eq.s32.totalorder %s463_s15, 0  ;;  %p100_p4 = scmp.eq.s32.totalorder %s463_s15, 1 }
   0xb   : > { %p70_p5 = por %p69_p1, %p68_p0  ;;  %p106_p6 = scmp.eq.s32.totalorder %s464_s16, 1 }
   0xc   : > { %p750_p7 = por %p744_p3, %p74_p2  ;;  %p754_p8 = por %p100_p4, %p68_p0 }
   0xd   : > { %p758_p9 = por %p106_p6, %p74_p2  ;;  %p465_p10 = scmp.ge.s32.totalorder %s682_s14, 1 }
   0xe   : > { %p113_p11 = scmp.lt.s32.totalorder %s682_s14, 3  ;;  %p503_p1 = scmp.lt.s32.totalorder %s682_s14, 2 }
   0xf   : > { %s1005_s21 = scalar_select %p758_p9, 1, 0 }
  0x10   : > { %p765_p13 = pnand %p465_p10, %p113_p11  ;;  %s135_s23 = sand.u32 1, %s670_s11  }
  0x11   : > { %p773_p2 = pnand %p503_p1, %p70_p5  ;;  %s31_s25 = sadd.s32 1, %s678_s13 }
  0x12   : > { %p490_p0 = pneg %p765_p13  ;;  %s478_s26 = smul.u32 6, %s135_s23 }
  0x13   : > { %p33_p6 = scmp.ge.s32.totalorder %s31_s25, 2  ;;  %s684_s27 = smov [#allocation2]  }
  0x14   : > { %p491_p4 = pnand %p490_p0, %p744_p3  ;;  %s479_s30 = smul.u32 96, %s678_s13 }
  0x15   : > { %s1016_s25 = smov (%p33_p6, %s31_s25), 0  ;;  %s139_s4 = scalar_lea.vmem [#allocation6], %s478_s26 }
  0x16   : > { %493 = dma.hbm_to_smem (!%p491_p4), %s999_s0, 16, %s684_s27, [#allocation5]  }
  0x17   : > { %s56_s3 = ssub.s32 %s678_s13, %s1016_s25  ;;  %s147_s5 = sshll.u32 %s139_s4, 4  ;;  %s148_s5 = int_to_ptr.vmem [resolvable:$true] %s147_s5 }
  0x18   : > { %p59_p5 = scmp.eq.s32.totalorder %s56_s3, 0  ;;  %s146_s8 = scalar_lea.hbm %s1000_s1, %s479_s30 }
  0x19   : > { %s136_s16 = scalar_lea.sflag [#allocation3], %s135_s23  ;;  %p572_p10 = pneg %p773_p2 }
  0x1a   : > { %s794_s15 = scalar_select %p59_p5, %s670_s11, %s61_s17  }
  0x1b   : > { %s583_s27 = scalar_lea.vmem %s148_s5, 96  ;;  %s685_s28 = smov [#allocation6]  }
  0x1c   : > { %p584_p11 = scmp.ne.s32.totalorder %s148_s5, %s583_s27  ;;  %s588_s29 = sshll.u32 %s685_s28, 4  ;;  %s589_s29 = int_to_ptr.vmem [resolvable:$false] %s588_s29 }
  0x1d   : > { %s590_s26 = scalar_lea.vmem %s589_s29, 192  ;;  %p591_p4 = scmp.lt.s32.totalorder %s148_s5, %s589_s29 }
  0x1e   : > { %p586_p1 = pnand %p584_p11, %p572_p10  ;;  %p592_p6 = scmp.lt.s32.totalorder %s590_s26, %s583_s27 }
  0x20   : > { %p587_p0 = pneg %p586_p1  ;;  %p593_p12 = por %p592_p6, %p591_p4 }
  0x22   : > { %p594_p9 = pnand %p593_p12, %p587_p0 }
  0x24   : > { %597 = shalt.err (!%p594_p9)
}
  0x25   : > { %s686_s30 = smov 32   ;;  %s687_s17 = smov 2  }
  0x26   : > { %497 = dma.hbm_to_vmem [thread:$0]  (!%p773_p2), %s146_s8, 96, %s148_s5, %s136_s16, %s686_s30, %s686_s30, %s687_s17  }
  0x27   : > { %159 = sbr.rel (%p765_p13) target bundleno = 118 (0x76), region = 28 }
  0x2c   : > { %649 = dma.done.wait (%p744_p3), [#allocation5], 16  }
  0x2d   : > { %651 = vsyncadd (%p744_p3), [#allocation5], 4294967280  ;;  %s807_s23 = sand.u32 1, %s666_s10  }
  0x2e   : > { %s480_s3 = smul.u32 6, %s807_s23  ;;  %s166_s4 = scalar_lea.sflag [#allocation3], %s807_s23 }
  0x30   : > { %s169_s24 = scalar_lea.vmem [#allocation6], %s480_s3 }
  0x31   : > { %653 = dma.done.wait (%p750_p7), %s166_s4, 96  }
  0x32   : > { %655 = vsyncadd (%p750_p7), %s166_s4, 4294967200 }
  0x33   : > { %174 = sfence }
  0x34   : > { %s818_s18 = smul.u32 30, %s674_s12  ;;  %v828_v0 = vld [vmem:[%s169_s24] sm:$0x3]  ;;  %v834_v2 = vld [vmem:[%s169_s24 + $0x2] sm:$0x3] }
  0x35   : > { %v839_v4 = vld [vmem:[%s169_s24 + $0x4] sm:$0x3] }
  0x36   : > { %s197_s22 = sld [smem:[#allocation2 + %s818_s18]]  ;;  %s198_s5 = sadd.s32 1, %s818_s18 }
  0x37   : > { %s199_s6 = sld [smem:[#allocation2 + %s198_s5]]  ;;  %s200_s7 = sadd.s32 2, %s818_s18 }
  0x38   : > { %s823_s8 = sld [smem:[#allocation2 + %s200_s7]]  ;;  %s202_s19 = sadd.s32 3, %s818_s18 }
  0x39   : > { %s203_s16 = sld [smem:[#allocation2 + %s202_s19]]  ;;  %s204_s27 = sadd.s32 4, %s818_s18 }
  0x3a   : > { %s205_s28 = sld [smem:[#allocation2 + %s204_s27]]  ;;  %s206_s29 = sadd.s32 5, %s818_s18 }
  0x3b   : > { %s207_s26 = sld [smem:[#allocation2 + %s206_s29]]  ;;  %s208_s30 = sadd.s32 6, %s818_s18 }
  0x3c   : > { %s831_s17 = sld [smem:[#allocation2 + %s208_s30]]  ;;  %s210_s4 = sadd.s32 7, %s818_s18  ;;  %v216_v1 = vstv %s197_s22 }
  0x3d   : > { %s836_s5 = sld [smem:[#allocation2 + %s210_s4]]  ;;  %s212_s7 = sadd.s32 8, %s818_s18  ;;  %v227_v3 = vstv %s199_s6  ;;  %v217_v5 = vmul.f32 %v216_v1, %v828_v0 }
  0x3e   : > { %s213_s19 = sld [smem:[#allocation2 + %s212_s7]]  ;;  %s214_s27 = sadd.s32 9, %s818_s18  ;;  %v236_v6 = vstv %s823_s8  ;;  %v228_v10 = vmul.f32 %v834_v2, %v227_v3 }
  0x3f   : > { %s844_s29 = sld [smem:[#allocation2 + %s214_s27]]  ;;  %v218_v7 = vstv %s203_s16  ;;  %s247_s24 = sadd.s32 10, %s818_s18  ;;  %v237_v13 = vmul.f32 %v839_v4, %v236_v6 }
  0x40   : > { %v219_v8 = vmul.f32 %v834_v2, %v218_v7  ;;  %v221_v9 = vstv %s205_s28  ;;  %s249_s22 = sadd.s32 11, %s818_s18  ;;  %s852_s6 = sld [smem:[#allocation2 + %s247_s24]] }
  0x41   : > { %v222_v11 = vmul.f32 %v839_v4, %v221_v9  ;;  %v229_v12 = vstv %s207_s26  ;;  %s251_s8 = sadd.s32 12, %s818_s18  ;;  %s856_s16 = sld [smem:[#allocation2 + %s249_s22]] }
  0x42   : > { %v220_v14 = vadd.f32 %v219_v8, %v217_v5  ;;  %v230_v15 = vmul.f32 %v839_v4, %v229_v12  ;;  %s253_s28 = sadd.s32 13, %s818_s18  ;;  %v224_v16 = vstv %s831_s17  ;;  %s861_s30 = sld [smem:[#allocation2 + %s251_s8]] }
  0x43   : > { %v232_v17 = vstv %s836_s5  ;;  %s255_s26 = sadd.s32 14, %s818_s18  ;;  %s254_s4 = sld [smem:[#allocation2 + %s253_s28]] }
  0x44   : > { %v223_v18 = vadd.f32 %v222_v11, %v220_v14  ;;  %v231_v19 = vadd.f32 %v230_v15, %v228_v10  ;;  %v238_v20 = vstv %s213_s19  ;;  %s257_s7 = sadd.s32 15, %s818_s18  ;;  %s256_s27 = sld [smem:[#allocation2 + %s255_s26]] }
  0x45   : > { %v239_v21 = vadd.f32 %v238_v20, %v237_v13  ;;  %s259_s24 = sadd.s32 16, %s818_s18  ;;  %s866_s17 = sld [smem:[#allocation2 + %s257_s7]]  ;;  %v242_v33 = vstv %s844_s29 }
  0x46   : > { %v225_v22 = vadd.f32 %v224_v16, %v223_v18  ;;  %v233_v23 = vadd.f32 %v232_v17, %v231_v19  ;;  %s261_s5 = sadd.s32 17, %s818_s18  ;;  %s869_s22 = sld [smem:[#allocation2 + %s259_s24]]  ;;  %v267_v24 = vstv %s852_s6 }
  0x47   : > { %s263_s8 = sadd.s32 18, %s818_s18  ;;  %v240_v27 = vmul.f32 %v839_v4, %v239_v21  ;;  %s876_s19 = sld [smem:[#allocation2 + %s261_s5]]  ;;  %v278_v28 = vstv %s856_s16  ;;  %v268_v29 = vmul.f32 %v267_v24, %v828_v0 }
  0x48   : > { %v226_v25 = vmul.f32 %v225_v22, %v828_v0  ;;  %v234_v26 = vmul.f32 %v834_v2, %v233_v23  ;;  %s265_s28 = sadd.s32 19, %s818_s18  ;;  %s880_s26 = sld [smem:[#allocation2 + %s263_s8]]  ;;  %v287_v30 = vstv %s861_s30  ;;  %v279_v36 = vmul.f32 %v834_v2, %v278_v28 }
  0x49   : > { %s299_s7 = sadd.s32 20, %s818_s18  ;;  %s885_s6 = sld [smem:[#allocation2 + %s265_s28]]  ;;  %v269_v32 = vstv %s254_s4  ;;  %v288_v40 = vmul.f32 %v839_v4, %v287_v30 }
  0x4a   : > { %v235_v31 = vadd.f32 %v234_v26, %v226_v25  ;;  %s301_s24 = sadd.s32 21, %s818_s18  ;;  %v270_v34 = vmul.f32 %v834_v2, %v269_v32  ;;  %v272_v35 = vstv %s256_s27  ;;  %s891_s16 = sld [smem:[#allocation2 + %s299_s7]] }
  0x4b   : > { %s303_s30 = sadd.s32 22, %s818_s18  ;;  %v273_v38 = vmul.f32 %v839_v4, %v272_v35  ;;  %v280_v39 = vstv %s866_s17  ;;  %s897_s29 = sld [smem:[#allocation2 + %s301_s24]] }
  0x4c   : > { %v241_v37 = vadd.f32 %v240_v27, %v235_v31  ;;  %s305_s4 = sadd.s32 23, %s818_s18  ;;  %v271_v41 = vadd.f32 %v270_v34, %v268_v29  ;;  %v281_v42 = vmul.f32 %v839_v4, %v280_v39  ;;  %s901_s27 = sld [smem:[#allocation2 + %s303_s30]]  ;;  %v275_v44 = vstv %s869_s22 }
  0x4d   : > { %s307_s5 = sadd.s32 24, %s818_s18  ;;  %v283_v45 = vstv %s876_s19  ;;  %s906_s8 = sld [smem:[#allocation2 + %s305_s4]] }
  0x4e   : > { %v243_v43 = vadd.f32 %v242_v33, %v241_v37  ;;  %s309_s17 = sadd.s32 25, %s818_s18  ;;  %v274_v46 = vadd.f32 %v273_v38, %v271_v41  ;;  %v282_v47 = vadd.f32 %v281_v42, %v279_v36  ;;  %v289_v48 = vstv %s880_s26  ;;  %s308_s28 = sld [smem:[#allocation2 + %s307_s5]] }
  0x4f   : > { %s311_s7 = sadd.s32 26, %s818_s18  ;;  %v290_v50 = vadd.f32 %v289_v48, %v288_v40  ;;  %s310_s24 = sld [smem:[#allocation2 + %s309_s17]]  ;;  %v293_v5 = vstv %s885_s6 }
  0x50   : > { %v244_v49 = vmax.f32 %v243_v43, 0.0  ;;  %s313_s30 = sadd.s32 27, %s818_s18  ;;  %v276_v51 = vadd.f32 %v275_v44, %v274_v46  ;;  %v284_v52 = vadd.f32 %v283_v45, %v282_v47  ;;  %s912_s22 = sld [smem:[#allocation2 + %s311_s7]]  ;;  %v319_v53 = vstv %s891_s16 }
  0x51   : > { %s315_s19 = sadd.s32 28, %s818_s18  ;;  %v291_v55 = vmul.f32 %v839_v4, %v290_v50  ;;  %s917_s26 = sld [smem:[#allocation2 + %s313_s30]]  ;;  %v330_v56 = vstv %s897_s29  ;;  %v320_v59 = vmul.f32 %v319_v53, %v828_v0 }
  0x52   : > { %v245_v54 = vmin.f32 %v244_v49, 1.0  ;;  %v277_v57 = vmul.f32 %v276_v51, %v828_v0  ;;  %v285_v58 = vmul.f32 %v834_v2, %v284_v52  ;;  %s316_s4 = sld [smem:[#allocation2 + %s315_s19]]  ;;  %v339_v60 = vstv %s901_s27  ;;  %s926_s5 = scalar_lea.vmem [#allocation7], %s480_s3 }
  0x53   : > { %v321_v61 = vstv %s906_s8  ;;  %s317_s16 = sadd.s32 29, %s818_s18  ;;  %v331_v3 = vmul.f32 %v834_v2, %v330_v56  ;;  %v340_v8 = vmul.f32 %v839_v4, %v339_v60  ;;  %s366_s18 = sshll.u32 %s926_s5, 4  ;;  %s945_s18 = int_to_ptr.vmem [resolvable:$true] %s366_s18 }
  0x54   : > { %246 = vst [vmem:[%s926_s5] sm:$0x3] %v245_v54  ;;  %v286_v62 = vadd.f32 %v285_v58, %v277_v57  ;;  %v322_v63 = vmul.f32 %v834_v2, %v321_v61  ;;  %v324_v1 = vstv %s308_s28  ;;  %s318_s3 = sld [smem:[#allocation2 + %s317_s16]]  ;;  %s481_s6 = smul.u32 96, %s674_s12 }
  0x55   : > { %v325_v6 = vmul.f32 %v839_v4, %v324_v1  ;;  %v332_v7 = vstv %s310_s24  ;;  %s352_s17 = scalar_lea.sflag [#allocation4], %s807_s23  ;;  %s598_s28 = scalar_lea.vmem %s945_s18, 96 }
  0x56   : > { %v292_v9 = vadd.f32 %v291_v55, %v286_v62  ;;  %v323_v10 = vadd.f32 %v322_v63, %v320_v59  ;;  %v333_v11 = vmul.f32 %v839_v4, %v332_v7  ;;  %v327_v12 = vstv %s912_s22  ;;  %s950_s8 = scalar_lea.hbm %s1001_s2, %s481_s6  ;;  %p599_p3 = scmp.ne.s32.totalorder %s945_s18, %s598_s28 }
  0x57   : > { %v335_v13 = vstv %s917_s26  ;;  %s688_s12 = smov [#allocation7]  }
  0x58   : > { %v294_v14 = vadd.f32 %v293_v5, %v292_v9  ;;  %v326_v15 = vadd.f32 %v325_v6, %v323_v10  ;;  %v334_v16 = vadd.f32 %v333_v11, %v331_v3  ;;  %v341_v17 = vstv %s316_s4  ;;  %p600_p7 = pnand %p599_p3, %p754_p8  ;;  %s602_s7 = sshll.u32 %s688_s12, 4  ;;  %s603_s7 = int_to_ptr.vmem [resolvable:$false] %s602_s7 }
  0x59   : > { %v342_v18 = vadd.f32 %v341_v17, %v340_v8  ;;  %s604_s24 = scalar_lea.vmem %s603_s7, 192  ;;  %p605_p12 = scmp.lt.s32.totalorder %s945_s18, %s603_s7 }
  0x5a   : > { %v295_v19 = vmax.f32 %v294_v14, 0.0  ;;  %v328_v20 = vadd.f32 %v327_v12, %v326_v15  ;;  %v336_v21 = vadd.f32 %v335_v13, %v334_v16  ;;  %v345_v27 = vstv %s318_s3  ;;  %p601_p9 = pneg %p600_p7  ;;  %p606_p13 = scmp.lt.s32.totalorder %s604_s24, %s598_s28 }
  0x5b   : > { %v343_v25 = vmul.f32 %v839_v4, %v342_v18 }
  0x5c   : > { %v296_v22 = vmin.f32 %v295_v19, 1.0  ;;  %v329_v23 = vmul.f32 %v328_v20, %v828_v0  ;;  %v337_v24 = vmul.f32 %v834_v2, %v336_v21  ;;  %p607_p2 = por %p606_p13, %p605_p12 }
  0x5e   : > { %473 = vst [vmem:[%s926_s5 + $0x2] sm:$0x3] %v296_v22  ;;  %v338_v26 = vadd.f32 %v337_v24, %v329_v23  ;;  %p608_p5 = pnand %p607_p2, %p601_p9 }
  0x60   : > { %v344_v28 = vadd.f32 %v343_v25, %v338_v26 }
  0x62   : > { %v346_v29 = vadd.f32 %v345_v27, %v344_v28 }
  0x64   : > { %v347_v30 = vmax.f32 %v346_v29, 0.0 }
  0x66   : > { %v348_v31 = vmin.f32 %v347_v30, 1.0 }
  0x68   : > { %474 = vst [vmem:[%s926_s5 + $0x4] sm:$0x3] %v348_v31 }
  0x69   : > { %611 = shalt.err (!%p608_p5)
}
  0x6a   : > { %s612_s30 = scalar_lea.hbm %s950_s8, 96  ;;  %s616_s26 = scalar_lea.hbm %s1001_s2, 192 }
  0x6b   : > { %p613_p10 = scmp.ne.s32.totalorder %s950_s8, %s612_s30  ;;  %p617_p0 = scmp.lt.s32.totalorder %s950_s8, %s1001_s2 }
  0x6c   : > { %p618_p4 = scmp.lt.s32.totalorder %s616_s26, %s612_s30 }
  0x6d   : > { %p614_p11 = pnand %p613_p10, %p754_p8 }
  0x6e   : > { %p619_p6 = por %p618_p4, %p617_p0 }
  0x6f   : > { %p615_p1 = pneg %p614_p11 }
  0x71   : > { %p620_p3 = pnand %p619_p6, %p615_p1 }
  0x73   : > { %623 = shalt.err (!%p620_p3)
}
  0x74   : > { %s689_s16 = smov 32   ;;  %s690_s3 = smov 2  }
  0x75   : > { %488 = dma.vmem_to_hbm [thread:$0]  (%p754_p8), %s945_s18, 96, %s950_s8, %s352_s17, %s689_s16, %s689_s16, %s690_s3  }
  0x76 PF: > { %s381_s6 = sand.u32 1, %s662_s9   ;;  %p1008_p7 = scmp.ne.s32.totalorder %s1005_s21, 0 }
  0x77   : > { %p1009_p9 = scmp.ge.s32.totalorder %s682_s14, 2  ;;  %s382_s29 = scalar_lea.sflag [#allocation4], %s381_s6 }
  0x79   : > { %p499_p12 = pnand %p1009_p9, %p1008_p7 }
  0x7b   : > { %p500_p13 = pneg %p499_p12 }
  0x7d   : > { %657 = dma.done.wait (%p500_p13), %s382_s29, 96  }
  0x7e   : > { %659 = vsyncadd (%p500_p13), %s382_s29, 4294967200  ;;  %s19_s14 = sadd.s32 1, %s682_s14   ;;  %s1010_s9 = smov %s666_s10 }
  0x7f   : > { %p16_p2 = scmp.ge.s32.totalorder %s19_s14, 4   ;;  %s1011_s10 = smov %s670_s11 }
  0x80   : > { %s1012_s11 = smov %s794_s15  ;;  %s1013_s12 = smov %s678_s13 }
  0x81   : > { %s1014_s13 = smov %s1016_s25  ;;  %18 = sbr.rel (!%p16_p2) target bundleno = 7 (0x7), region = 82 }
  0x86   :  { %387 = vsyncpa [#allocation3], 1 }
  0x87   :  { %389 = vsyncpa [#allocation3 + $0x1], 1 }
  0x88   :  { %390 = vsyncpa [#allocation4], 1 }
  0x89   :  { %392 = vsyncpa [#allocation4 + $0x1], 1 }
  0x8a   :  { %393 = vsyncpa [#allocation5], 1 }
  0x8b   :  { %395 = vsyncpa [#allocation5 + $0x1], 1 }

</bundles_post_ra>
